<compile_context>
chip_gen: v5e
topology: v5e:2x2
jax: 0.10.0
libtpu: 0.0.40
codegen_flags: <defaults>
</compile_context>

<pallas_src>
import functools

import jax
import jax.numpy as jnp
from jax.experimental import pallas as pl
from jax.experimental.pallas import tpu as pltpu

# ---- synthetic "tokenizer" constants (stand-ins for t5 token ids) ----------
VOCAB = 128      # small vocab, lane-aligned (real t5: 32128, padded in-wrapper)
D_MODEL = 32
PAD_ID = 0
EOS_ID = 1
REL_ID = 2       # tokenizer.encode('true')[0]
NREL_ID = 3      # tokenizer.encode('false')[0]
IGNORE_INDEX = -100


def _round_up(x, m):
    return (x + m - 1) // m * m


def _tpu_kind():
    try:
        return jax.devices()[0].device_kind.lower()
    except Exception:
        return ""


def _pick_tile_v(v):
    # Lane-dense vocab tile; the vocab is padded up to a multiple of this so a
    # 32128 vocab becomes 32 x 1024 grid steps instead of 251 x 128.
    if v <= 512:
        return _round_up(v, 128)
    return 1024


def _pick_tile_n(n, kind):
    # Big row tiles amortize re-streaming of W (whose index_map is (0, v)),
    # while keeping >=2 row tiles so both v7x TensorCores get work on the
    # "parallel" axis.  Cap lower on v7x (64 MiB physical VMEM).
    cap = 512 if "v7" in kind else 1024
    if n <= 8:
        return 8
    return min(cap, _round_up((n + 1) // 2, 8))


# ---------------------------------------------------------------------------
# Pallas kernel: LM-head matmul fused with online log-sum-exp cross-entropy
# ---------------------------------------------------------------------------
def lmhead_ce_kernel(h_ref, w_ref, lbl_ref, logits_ref, loss_ref,
                     m_sc, l_sc, tgt_sc, *, v_actual, use_bf16_exp):
    # h_ref:      [TILE_N, D_PAD]    bf16  decoder hidden states (row tile)
    # w_ref:      [D_PAD, TILE_V]    bf16  LM head weight (vocab tile)
    # lbl_ref:    [TILE_N, 1]        i32   target token id per row (-100 = ignore)
    # logits_ref: [TILE_N, TILE_V]   bf16  logits tile (lane-dense writeback)
    # loss_ref:   [1, 8, 128]        f32   per-row-tile NLL sum (broadcast block)
    # m_sc/l_sc/tgt_sc: [TILE_N, 1]  f32   running max / running sum-exp / target logit
    v = pl.program_id(1)
    nv = pl.num_programs(1)
    tile_v = w_ref.shape[1]

    @pl.when(v == 0)
    def _init():
        m_sc[...] = jnp.full(m_sc.shape, -jnp.inf, dtype=m_sc.dtype)
        l_sc[...] = jnp.zeros(l_sc.shape, dtype=l_sc.dtype)
        tgt_sc[...] = jnp.zeros(tgt_sc.shape, dtype=tgt_sc.dtype)

    # bf16 x bf16 -> f32 accumulate on the MXU.
    logits = jnp.dot(h_ref[...], w_ref[...], preferred_element_type=jnp.float32)
    logits_ref[...] = logits.astype(logits_ref.dtype)

    lbl = lbl_ref[...]                                        # [TILE_N, 1] i32
    iota = jax.lax.broadcasted_iota(jnp.int32, logits.shape, 1)

    # target-logit gather against the block-local label id (labels < v_actual,
    # so padded vocab columns can never match; ignore rows never match either)
    onehot = iota == (lbl - v * tile_v)                       # [TILE_N, TILE_V]
    tgt_sc[...] += jnp.sum(jnp.where(onehot, logits, 0.0), axis=-1, keepdims=True)

    if v_actual is not None:
        # mask vocab-padding columns out of the log-sum-exp
        lim = v_actual - v * tile_v
        logits = jnp.where(iota < lim, logits, -jnp.inf)

    # online (flash-style) log-sum-exp over the vocab grid axis
    m_prev = m_sc[...]
    m_new = jnp.maximum(m_prev, jnp.max(logits, axis=-1, keepdims=True))
    x = logits - m_new
    if use_bf16_exp:
        # bf16 EUP on v6e/v7x; accumulate the row sum in f32
        p_sum = jnp.sum(jnp.exp(x.astype(jnp.bfloat16)).astype(jnp.float32),
                        axis=-1, keepdims=True)
    else:
        p_sum = jnp.sum(jnp.exp(x), axis=-1, keepdims=True)
    l_sc[...] = jnp.exp(m_prev - m_new) * l_sc[...] + p_sum
    m_sc[...] = m_new

    @pl.when(v == nv - 1)
    def _finalize():
        lse = m_sc[...] + jnp.log(l_sc[...])                  # [TILE_N, 1]
        nll = lse - tgt_sc[...]
        nll = jnp.where(lbl >= 0, nll, 0.0)                   # ignore_index handling
        total = jnp.sum(nll)                                  # scalar
        loss_ref[...] = jnp.broadcast_to(total, loss_ref.shape).astype(loss_ref.dtype)


def lm_head_cross_entropy(hidden, w_lm, labels):
    """hidden: [N, D] f32, w_lm: [D, V] f32, labels: [N] i32
       -> (logits [N, V] bf16, loss scalar f32)."""
    N, D = hidden.shape
    V = w_lm.shape[1]
    kind = _tpu_kind()

    tile_v = _pick_tile_v(V)
    v_pad = _round_up(V, tile_v)
    v_tiles = v_pad // tile_v

    tile_n = _pick_tile_n(N, kind)
    n_pad = _round_up(N, tile_n)
    n_tiles = n_pad // tile_n

    d_pad = _round_up(D, 128)     # dense lane layout for h, full-depth MXU passes

    # bf16 operands for the MXU; zero-pad rows/contraction/vocab (row padding is
    # masked in-kernel via label == -100, vocab padding via -inf in the LSE).
    h_bf16 = jnp.pad(hidden, ((0, n_pad - N), (0, d_pad - D))).astype(jnp.bfloat16)
    w_bf16 = jnp.pad(w_lm, ((0, d_pad - D), (0, v_pad - V))).astype(jnp.bfloat16)
    lbl = jnp.pad(labels.astype(jnp.int32), (0, n_pad - N),
                  constant_values=IGNORE_INDEX).reshape(n_pad, 1)

    use_bf16_exp = ("v6" in kind) or ("v7" in kind)   # no bf16 EUP on v5e/older

    # deeper W pipelining only matters when per-step compute is tiny and there
    # are many vocab steps; guarded so older Pallas versions fall back cleanly
    w_map = lambda i, v: (0, v)
    n_w_buf = 2
    w_spec = pl.BlockSpec((d_pad, tile_v), w_map)
    if v_tiles >= 3 and d_pad <= 128 and hasattr(pl, "Buffered"):
        try:
            w_spec = pl.BlockSpec((d_pad, tile_v), w_map,
                                  pipeline_mode=pl.Buffered(3))
            n_w_buf = 3
        except Exception:
            w_spec = pl.BlockSpec((d_pad, tile_v), w_map)
            n_w_buf = 2

    # explicit VMEM budget: pipelined buffers + scratch + in-kernel f32 temps
    vmem_budget = (2 * tile_n * d_pad * 2            # h (double buffered)
                   + n_w_buf * d_pad * tile_v * 2    # w buffers
                   + 2 * tile_n * 128 * 4            # labels (lane-padded)
                   + 2 * tile_n * tile_v * 2         # logits out (double buffered)
                   + 2 * 8 * 128 * 4                 # loss out
                   + 3 * tile_n * 128 * 4            # scratch m/l/tgt (lane-padded)
                   + 3 * tile_n * tile_v * 4         # f32 logits/exp temporaries
                   + (4 << 20))                      # headroom
    vmem_limit = int(min(max(vmem_budget, 16 << 20), 48 << 20))

    kernel = functools.partial(
        lmhead_ce_kernel,
        v_actual=(V if v_pad != V else None),
        use_bf16_exp=use_bf16_exp,
    )

    logits_pad, loss_parts = pl.pallas_call(
        kernel,
        out_shape=(
            jax.ShapeDtypeStruct((n_pad, v_pad), jnp.bfloat16),
            jax.ShapeDtypeStruct((n_tiles, 8, 128), jnp.float32),
        ),
        grid_spec=pltpu.PrefetchScalarGridSpec(
            num_scalar_prefetch=0,
            grid=(n_tiles, v_tiles),                 # reduction (vocab) axis last
            in_specs=[
                pl.BlockSpec((tile_n, d_pad), lambda i, v: (i, 0)),
                w_spec,
                pl.BlockSpec((tile_n, 1), lambda i, v: (i, 0)),
            ],
            out_specs=(
                pl.BlockSpec((tile_n, tile_v), lambda i, v: (i, v)),
                pl.BlockSpec((1, 8, 128), lambda i, v: (i, 0, 0)),
            ),
            scratch_shapes=[
                pltpu.VMEM((tile_n, 1), jnp.float32),   # running max
                pltpu.VMEM((tile_n, 1), jnp.float32),   # running sum-exp
                pltpu.VMEM((tile_n, 1), jnp.float32),   # target logit
            ],
        ),
        compiler_params=pltpu.CompilerParams(
            dimension_semantics=("parallel", "arbitrary"),
            vmem_limit_bytes=vmem_limit,
        ),
    )(h_bf16, w_bf16, lbl)

    n_valid = jnp.maximum(jnp.sum(labels >= 0), 1).astype(jnp.float32)
    loss = jnp.sum(loss_parts[:, 0, 0]) / n_valid
    return logits_pad[:N, :V], loss


# ---------------------------------------------------------------------------
# Baseline equivalent (surrogate encoder/decoder glue around the hot path)
# ---------------------------------------------------------------------------
def init_params(key):
    k1, k2, k3 = jax.random.split(key, 3)
    return {
        "embed": jax.random.normal(k1, (VOCAB, D_MODEL), jnp.float32) * 0.02,
        "w_dec": jax.random.normal(k2, (D_MODEL, D_MODEL), jnp.float32) * 0.02,
        "w_lm":  jax.random.normal(k3, (D_MODEL, VOCAB), jnp.float32) * 0.02,
    }


def gen_labels(batch_size):
    # 'true' if i % 2 == 0 else 'false', plus EOS (tokenizer padding behaviour)
    tok = jnp.where(jnp.arange(batch_size) % 2 == 0, REL_ID, NREL_ID).astype(jnp.int32)
    eos = jnp.full((batch_size,), EOS_ID, jnp.int32)
    return jnp.stack([tok, eos], axis=1)                    # [B, 2]


def _decoder_hidden(params, input_ids, attention_mask, labels):
    B = input_ids.shape[0]
    # --- encoder (glue): embed + masked mean pool ---
    enc = params["embed"][input_ids]                        # [B, S, D]
    mask = attention_mask[..., None].astype(jnp.float32)
    enc_pooled = (enc * mask).sum(axis=1) / jnp.maximum(mask.sum(axis=1), 1.0)
    # --- decoder (glue): shift-right labels, project ---
    dec_ids = jnp.concatenate(
        [jnp.full((B, 1), PAD_ID, jnp.int32), labels[:, :-1]], axis=1)
    dec_emb = params["embed"][dec_ids]                      # [B, L, D]
    return jnp.tanh(
        jnp.einsum("bld,de->ble", dec_emb + enc_pooled[:, None, :], params["w_dec"]))


def baseline_forward(params, input_ids, attention_mask):
    B, _ = input_ids.shape
    labels = gen_labels(B)                                  # x['labels'] = gen_labels(...)
    dec_h = _decoder_hidden(params, input_ids, attention_mask, labels)  # [B, L, D]
    L = dec_h.shape[1]

    # --- hot path (Pallas): LM head matmul + cross-entropy vs labels ---
    hidden_flat = dec_h.reshape(B * L, D_MODEL)
    logits_flat, loss = lm_head_cross_entropy(hidden_flat, params["w_lm"],
                                              labels.reshape(B * L))
    logits = logits_flat.reshape(B, L, VOCAB)               # bf16 (halved writeback)
    return {"loss": loss, "logits": logits, "labels": labels}


if __name__ == "__main__":
    key = jax.random.PRNGKey(0)
    pk, ik = jax.random.split(key)
    params = init_params(pk)

    B, S = 2, 8
    input_ids = jax.random.randint(ik, (B, S), minval=4, maxval=VOCAB, dtype=jnp.int32)
    attention_mask = jnp.ones((B, S), jnp.int32)

    out = baseline_forward(params, input_ids, attention_mask)
    jax.block_until_ready(out["loss"])
    jax.block_until_ready(out["logits"])
    assert out["logits"].shape == (B, 2, VOCAB)
    assert out["loss"].shape == ()

    # lightweight correctness check against a pure-JAX reference (bf16-cast matmul)
    labels = out["labels"]
    dec_h = _decoder_hidden(params, input_ids, attention_mask, labels)
    h_flat = dec_h.reshape(-1, D_MODEL)
    ref_logits = (h_flat.astype(jnp.bfloat16).astype(jnp.float32)
                  @ params["w_lm"].astype(jnp.bfloat16).astype(jnp.float32))
    lbl_flat = labels.reshape(-1)
    ref_lse = jax.scipy.special.logsumexp(ref_logits, axis=-1)
    ref_nll = ref_lse - ref_logits[jnp.arange(lbl_flat.shape[0]), lbl_flat]
    ref_loss = ref_nll.mean()
    assert abs(float(out["loss"]) - float(ref_loss)) < 2e-2
    assert float(jnp.max(jnp.abs(
        out["logits"].astype(jnp.float32).reshape(-1, VOCAB) - ref_logits))) < 2e-2

    print("KERNEL_OK")
</pallas_src>

<mosaic_0001>
module attributes {stable_mosaic.version = 11 : i64} {
  func.func @lmhead_ce_kernel(%arg0: i32, %arg1: i32, %arg2: memref<8x128xbf16, #tpu.memory_space<vmem>>, %arg3: memref<128x128xbf16, #tpu.memory_space<vmem>>, %arg4: memref<8x1xi32, #tpu.memory_space<vmem>>, %arg5: memref<8x128xbf16, #tpu.memory_space<vmem>>, %arg6: memref<1x8x128xf32, #tpu.memory_space<vmem>>, %arg7: memref<8x1xf32, #tpu.memory_space<vmem>>, %arg8: memref<8x1xf32, #tpu.memory_space<vmem>>, %arg9: memref<8x1xf32, #tpu.memory_space<vmem>>) attributes {dimension_semantics = [#tpu.dimension_semantics<parallel>, #tpu.dimension_semantics<arbitrary>], iteration_bounds = array<i64: 1, 1>, scalar_prefetch = 0 : i64, scratch_operands = 3 : i64, tpu.core_type = #tpu.core_type<tc>, window_params = [{transform_indices = @transform_0, window_bounds = array<i64: 8, 128>}, {transform_indices = @transform_1, window_bounds = array<i64: 128, 128>}, {transform_indices = @transform_2, window_bounds = array<i64: 8, 1>}, {transform_indices = @transform_3, window_bounds = array<i64: 8, 128>}, {transform_indices = @transform_4, window_bounds = array<i64: 1, 8, 128>}]} {
    %c0_i32 = arith.constant 0 : i32
    %0 = arith.cmpi eq, %arg1, %c0_i32 : i32
    %1 = arith.extui %0 : i1 to i32
    %c0_i32_0 = arith.constant 0 : i32
    %2 = arith.cmpi ne, %1, %c0_i32_0 : i32
    scf.if %2 {
      %cst_26 = arith.constant 0xFF800000 : f32
      %41 = vector.broadcast %cst_26 : f32 to vector<8x1xf32>
      %c0_27 = arith.constant 0 : index
      %c0_28 = arith.constant 0 : index
      %42 = vector.load %arg7[%c0_27, %c0_28] : memref<8x1xf32, #tpu.memory_space<vmem>>, vector<8x1xf32>
      tpu.vector_store %arg7[%c0_27, %c0_28], %41 {strides = array<i32>} : memref<8x1xf32, #tpu.memory_space<vmem>>, vector<8x1xf32>,
      %cst_29 = arith.constant 0.000000e+00 : f32
      %43 = vector.broadcast %cst_29 : f32 to vector<8x1xf32>
      %c0_30 = arith.constant 0 : index
      %c0_31 = arith.constant 0 : index
      %44 = vector.load %arg8[%c0_30, %c0_31] : memref<8x1xf32, #tpu.memory_space<vmem>>, vector<8x1xf32>
      tpu.vector_store %arg8[%c0_30, %c0_31], %43 {strides = array<i32>} : memref<8x1xf32, #tpu.memory_space<vmem>>, vector<8x1xf32>,
      %cst_32 = arith.constant 0.000000e+00 : f32
      %45 = vector.broadcast %cst_32 : f32 to vector<8x1xf32>
      %c0_33 = arith.constant 0 : index
      %c0_34 = arith.constant 0 : index
      %46 = vector.load %arg9[%c0_33, %c0_34] : memref<8x1xf32, #tpu.memory_space<vmem>>, vector<8x1xf32>
      tpu.vector_store %arg9[%c0_33, %c0_34], %45 {strides = array<i32>} : memref<8x1xf32, #tpu.memory_space<vmem>>, vector<8x1xf32>,
    } else {
    }
    %c0 = arith.constant 0 : index
    %c0_1 = arith.constant 0 : index
    %3 = vector.load %arg2[%c0, %c0_1] : memref<8x128xbf16, #tpu.memory_space<vmem>>, vector<8x128xbf16>
    %c0_2 = arith.constant 0 : index
    %c0_3 = arith.constant 0 : index
    %4 = vector.load %arg3[%c0_2, %c0_3] : memref<128x128xbf16, #tpu.memory_space<vmem>>, vector<128x128xbf16>
    %cst = arith.constant dense<0.000000e+00> : vector<8x128xf32>
    %5 = tpu.matmul %3, %4, %cst {dimension_numbers = #tpu.dot_dimension_numbers<[1], [0], [0], [1], [0, 0, 1, 1], [], []>} : vector<8x128xbf16>, vector<128x128xbf16>, vector<8x128xf32> -> vector<8x128xf32>
    %6 = arith.truncf %5 : vector<8x128xf32> to vector<8x128xbf16>
    %c0_4 = arith.constant 0 : index
    %c0_5 = arith.constant 0 : index
    %7 = vector.load %arg5[%c0_4, %c0_5] : memref<8x128xbf16, #tpu.memory_space<vmem>>, vector<8x128xbf16>
    tpu.vector_store %arg5[%c0_4, %c0_5], %6 {strides = array<i32>} : memref<8x128xbf16, #tpu.memory_space<vmem>>, vector<8x128xbf16>,
    %c0_6 = arith.constant 0 : index
    %c0_7 = arith.constant 0 : index
    %8 = vector.load %arg4[%c0_6, %c0_7] : memref<8x1xi32, #tpu.memory_space<vmem>>, vector<8x1xi32>
    %9 = tpu.iota {dimensions = array<i32: 1>} : vector<8x128xi32>
    %c128_i32 = arith.constant 128 : i32
    %10 = arith.muli %arg1, %c128_i32 : i32
    %11 = vector.broadcast %10 : i32 to vector<8x1xi32>
    %12 = arith.subi %8, %11 : vector<8x1xi32>
    %13 = vector.broadcast %12 : vector<8x1xi32> to vector<8x128xi32>
    %14 = arith.cmpi eq, %9, %13 : vector<8x128xi32>
    %c0_8 = arith.constant 0 : index
    %c0_9 = arith.constant 0 : index
    %15 = vector.load %arg9[%c0_8, %c0_9] : memref<8x1xf32, #tpu.memory_space<vmem>>, vector<8x1xf32>
    %cst_10 = arith.constant 0.000000e+00 : f32
    %16 = vector.broadcast %cst_10 : f32 to vector<8x128xf32>
    %17 = arith.select %14, %5, %16 : vector<8x128xi1>, vector<8x128xf32>
    %cst_11 = arith.constant dense<0.000000e+00> : vector<8xf32>
    %18 = vector.multi_reduction <add>, %17, %cst_11 [1] : vector<8x128xf32> to vector<8xf32>
    %19 = vector.shape_cast %18 : vector<8xf32> to vector<8x1xf32>
    %20 = arith.addf %15, %19 : vector<8x1xf32>
    %c0_12 = arith.constant 0 : index
    %c0_13 = arith.constant 0 : index
    %21 = vector.load %arg9[%c0_12, %c0_13] : memref<8x1xf32, #tpu.memory_space<vmem>>, vector<8x1xf32>
    tpu.vector_store %arg9[%c0_12, %c0_13], %20 {strides = array<i32>} : memref<8x1xf32, #tpu.memory_space<vmem>>, vector<8x1xf32>,
    %c0_14 = arith.constant 0 : index
    %c0_15 = arith.constant 0 : index
    %22 = vector.load %arg7[%c0_14, %c0_15] : memref<8x1xf32, #tpu.memory_space<vmem>>, vector<8x1xf32>
    %cst_16 = arith.constant dense<0xFF800000> : vector<8xf32>
    %23 = vector.multi_reduction <maximumf>, %5, %cst_16 [1] : vector<8x128xf32> to vector<8xf32>
    %24 = vector.shape_cast %23 : vector<8xf32> to vector<8x1xf32>
    %25 = arith.maximumf %22, %24 : vector<8x1xf32>
    %26 = vector.broadcast %25 : vector<8x1xf32> to vector<8x128xf32>
    %27 = arith.subf %5, %26 : vector<8x128xf32>
    %28 = math.exp %27 : vector<8x128xf32>
    %cst_17 = arith.constant dense<0.000000e+00> : vector<8xf32>
    %29 = vector.multi_reduction <add>, %28, %cst_17 [1] : vector<8x128xf32> to vector<8xf32>
    %30 = vector.shape_cast %29 : vector<8xf32> to vector<8x1xf32>
    %31 = arith.subf %22, %25 : vector<8x1xf32>
    %32 = math.exp %31 : vector<8x1xf32>
    %c0_18 = arith.constant 0 : index
    %c0_19 = arith.constant 0 : index
    %33 = vector.load %arg8[%c0_18, %c0_19] : memref<8x1xf32, #tpu.memory_space<vmem>>, vector<8x1xf32>
    %34 = arith.mulf %32, %33 : vector<8x1xf32>
    %35 = arith.addf %34, %30 : vector<8x1xf32>
    %c0_20 = arith.constant 0 : index
    %c0_21 = arith.constant 0 : index
    %36 = vector.load %arg8[%c0_20, %c0_21] : memref<8x1xf32, #tpu.memory_space<vmem>>, vector<8x1xf32>
    tpu.vector_store %arg8[%c0_20, %c0_21], %35 {strides = array<i32>} : memref<8x1xf32, #tpu.memory_space<vmem>>, vector<8x1xf32>,
    %c0_22 = arith.constant 0 : index
    %c0_23 = arith.constant 0 : index
    %37 = vector.load %arg7[%c0_22, %c0_23] : memref<8x1xf32, #tpu.memory_space<vmem>>, vector<8x1xf32>
    tpu.vector_store %arg7[%c0_22, %c0_23], %25 {strides = array<i32>} : memref<8x1xf32, #tpu.memory_space<vmem>>, vector<8x1xf32>,
    %c0_i32_24 = arith.constant 0 : i32
    %38 = arith.cmpi eq, %arg1, %c0_i32_24 : i32
    %39 = arith.extui %38 : i1 to i32
    %c0_i32_25 = arith.constant 0 : i32
    %40 = arith.cmpi ne, %39, %c0_i32_25 : i32
    scf.if %40 {
      %c0_26 = arith.constant 0 : index
      %c0_27 = arith.constant 0 : index
      %41 = vector.load %arg7[%c0_26, %c0_27] : memref<8x1xf32, #tpu.memory_space<vmem>>, vector<8x1xf32>
      %c0_28 = arith.constant 0 : index
      %c0_29 = arith.constant 0 : index
      %42 = vector.load %arg8[%c0_28, %c0_29] : memref<8x1xf32, #tpu.memory_space<vmem>>, vector<8x1xf32>
      %43 = math.log %42 : vector<8x1xf32>
      %44 = arith.addf %41, %43 : vector<8x1xf32>
      %c0_30 = arith.constant 0 : index
      %c0_31 = arith.constant 0 : index
      %45 = vector.load %arg9[%c0_30, %c0_31] : memref<8x1xf32, #tpu.memory_space<vmem>>, vector<8x1xf32>
      %46 = arith.subf %44, %45 : vector<8x1xf32>
      %c0_i32_32 = arith.constant 0 : i32
      %47 = vector.broadcast %c0_i32_32 : i32 to vector<8x1xi32>
      %48 = arith.cmpi sge, %8, %47 : vector<8x1xi32>
      %cst_33 = arith.constant 0.000000e+00 : f32
      %49 = vector.broadcast %cst_33 : f32 to vector<8x1xf32>
      %50 = arith.select %48, %46, %49 : vector<8x1xi1>, vector<8x1xf32>
      %51 = vector.shape_cast %50 : vector<8x1xf32> to vector<1x8x1xf32>
      %cst_34 = arith.constant dense<0.000000e+00> : vector<1xf32>
      %52 = vector.multi_reduction <add>, %51, %cst_34 [1, 2] : vector<1x8x1xf32> to vector<1xf32>
      %53 = vector.shape_cast %52 : vector<1xf32> to vector<1x1x1xf32>
      %54 = vector.extract %53[0, 0, 0] : f32 from vector<1x1x1xf32>
      %55 = vector.broadcast %54 : f32 to vector<1x8x128xf32>
      %c0_35 = arith.constant 0 : index
      %c0_36 = arith.constant 0 : index
      %c0_37 = arith.constant 0 : index
      %56 = vector.load %arg6[%c0_35, %c0_36, %c0_37] : memref<1x8x128xf32, #tpu.memory_space<vmem>>, vector<1x8x128xf32>
      tpu.vector_store %arg6[%c0_35, %c0_36, %c0_37], %55 {strides = array<i32>} : memref<1x8x128xf32, #tpu.memory_space<vmem>>, vector<1x8x128xf32>,
    } else {
    }
    return
  }
  func.func @transform_0(%arg0: i32, %arg1: i32) -> (i32, i32) {
    %c0_i32 = arith.constant 0 : i32
    %c0_i32_0 = arith.constant 0 : i32
    return %arg0, %c0_i32 : i32, i32
  }
  func.func @transform_1(%arg0: i32, %arg1: i32) -> (i32, i32) {
    %c0_i32 = arith.constant 0 : i32
    %c0_i32_0 = arith.constant 0 : i32
    return %c0_i32, %arg1 : i32, i32
  }
  func.func @transform_2(%arg0: i32, %arg1: i32) -> (i32, i32) {
    %c0_i32 = arith.constant 0 : i32
    %c0_i32_0 = arith.constant 0 : i32
    return %arg0, %c0_i32 : i32, i32
  }
  func.func @transform_3(%arg0: i32, %arg1: i32) -> (i32, i32) {
    %c0_i32 = arith.constant 0 : i32
    return %arg0, %arg1 : i32, i32
  }
  func.func @transform_4(%arg0: i32, %arg1: i32) -> (i32, i32, i32) {
    %c0_i32 = arith.constant 0 : i32
    %c0_i32_0 = arith.constant 0 : i32
    %c0_i32_1 = arith.constant 0 : i32
    return %arg0, %c0_i32, %c0_i32_0 : i32, i32, i32
  }
}

</mosaic_0001>

<bundles_post_ra>
// kernel: tpu_custom_call.1
= control target key start
LH: loop header
LB: loop body
LE: loop exit
PB: predicated region body
PF: predicated region fallthrough
CT: control target
= control target key end

     0   :  { %10 = vsyncpa [#allocation6], 0  ;;  %s413_s0 = inlined_call_operand.vmem [shape: bf16[8,128], index: 0, kind: input, shape index: {}]   ;;  %s414_s1 = inlined_call_operand.hbm [shape: bf16[128,128], index: 1, kind: input, shape index: {}]   ;;  %s415_s2 = inlined_call_operand.vmem [shape: s32[8,1], index: 2, kind: input, shape index: {}]   ;;  %s416_s3 = inlined_call_operand.hbm [shape: bf16[8,128], index: 3, kind: output, shape index: {0}]   ;;  %s417_s4 = inlined_call_operand.hbm [shape: f32[1,8,128], index: 4, kind: output, shape index: {1}]  }
   0x1   :  { %11 = vsyncpa [#allocation7], 0 }
   0x2   :  { %12 = vsyncpa [#allocation10], 0  ;;  %s19_s17 = sshll.u32 %s414_s1, 4  ;;  %s354_s18 = smov [#allocation5]   ;;  %s20_s17 = int_to_ptr.hbm [resolvable:$true] %s19_s17 }
   0x3   :  { %s21_s19 = sshll.u32 %s354_s18, 4  ;;  %s355_s20 = smov 64   ;;  %s22_s19 = int_to_ptr.vmem [resolvable:$true] %s21_s19 }
   0x4   :  { %s356_s21 = smov 4  }
   0x5   :  { %27 = dma.hbm_to_vmem [thread:$0]  %s20_s17, 1024, %s22_s19, [#allocation6], %s355_s20, %s355_s20, %s356_s21  }
   0x6   :  { %348 = dma.done.wait [#allocation6], 1024  }
   0x7   :  { %349 = vsyncadd [#allocation6], 4294966272  ;;  %v257_v0 = vld [vmem:[#allocation5 + $0x38] sm:$0xff]  ;;  %v256_v1 = vld [vmem:[#allocation5 + $0x30] sm:$0xff]  ;;  %v357_v2 = vmov 0   ;;  %vm38_vm0 = vcmask 7168   ;;  %v123_v12 = vlaneseq }
   0x8   :  { %107 = vmatpush.bf16.msra.mxu0 %v257_v0  ;;  %269 = vset.pattern.permute.xlu1 %v357_v2  ;;  %v393_v3 = vld [vmem:[%s415_s2] sm:$0xff]  ;;  %v254_v5 = vld [vmem:[#allocation5 + $0x20] sm:$0xff]  ;;  %v253_v6 = vld [vmem:[#allocation5 + $0x18] sm:$0xff]  ;;  %v358_v11 = vmov -inf   ;;  %v359_v19 = vmov 0.0   ;;  %s192_s27 = sshll.u32 %s416_s3, 4  ;;  %s193_s27 = int_to_ptr.hbm [resolvable:$true] %s192_s27 }
   0x9   :  { %268 = vset.pattern.permute.xlu0 %v357_v2  ;;  %129 = vperm.xlu1 %269, %v393_v3   ;;  %v255_v4 = vld [vmem:[#allocation5 + $0x28] sm:$0xff]  ;;  %v252_v7 = vld [vmem:[#allocation5 + $0x10] sm:$0xff]  ;;  %v250_v9 = vld [vmem:[#allocation5] sm:$0xff]  ;;  %39 = vst.msk [vmem:[#allocation2] sm:$0xff] %vm38_vm0, %v358_v11  ;;  %v124_v13 = vand.u32 127, %v123_v12  ;;  %vm171_vm2 = vcmp.ge.s32.totalorder %v393_v3, 0 }
   0xa   :  { %v251_v8 = vld [vmem:[#allocation5 + $0x8] sm:$0xff]  ;;  %41 = vst.msk [vmem:[#allocation4] sm:$0xff] %vm38_vm0, %v359_v19  ;;  %s361_s28 = smov [#allocation9]   ;;  %s203_s6 = sshll.u32 %s417_s4, 4  ;;  %s204_s6 = int_to_ptr.hbm [resolvable:$true] %s203_s6 }
   0xb   :  { %v42_v10 = vld [vmem:[%s413_s0] sm:$0xf]  ;;  %40 = vst.msk [vmem:[#allocation3] sm:$0xff] %vm38_vm0, %v359_v19  ;;  %s360_s0 = smov [#allocation8]   ;;  %s201_s29 = sshll.u32 %s361_s28, 4  ;;  %s202_s29 = int_to_ptr.vmem [resolvable:$true] %s201_s29 }
   0xc   :  { %108 = vmatpush.bf16.msra.mxu0 %v256_v1  ;;  %s190_s2 = sshll.u32 %s360_s0, 4  ;;  %s191_s2 = int_to_ptr.vmem [resolvable:$true] %s190_s2 }
  0x10   :  { %109 = vmatpush.bf16.msra.mxu0 %v255_v4  ;;  %v139_v20 = vld [vmem:[#allocation2] sm:$0xff] }
  0x11   :  { %v132_v21 = vld [vmem:[#allocation4] sm:$0xff] }
  0x12   :  { %v156_v33 = vld [vmem:[#allocation3] sm:$0xff] }
  0x14   :  { %110 = vmatpush.bf16.msra.mxu0 %v254_v5 }
  0x18   :  { %111 = vmatpush.bf16.msra.mxu0 %v253_v6 }
  0x1c   :  { %112 = vmatpush.bf16.msra.mxu0 %v252_v7 }
  0x20   :  { %113 = vmatpush.bf16.msra.mxu0 %v251_v8 }
  0x24   :  { %114 = vmatpush.bf16.msra.mxu0 %v250_v9 }
  0x27   :  { %115 = vmatmul.bf16.vlgmr.msra.gmra.mxu0 %v42_v10 }
  0x7b   :  { %v130_v14 = vpop.permute.xlu1 %129 }
  0x7c   :  { %vm131_vm1 = vcmp.eq.s32.totalorder %v124_v13, %v130_v14 }
  0xa4   :  { %v116_v15 = vpop.f32.mrf.mxu0 }
  0xa5   :  { %140 = vmax.xlane.f32.xlu0 %v116_v15  ;;  %v133_v16 = vsel %vm131_vm1, %v116_v15, 0.0  ;;  %v120_v17 = vpack.c.bf16 %v116_v15, %v116_v15 }
  0xa6   :  { %134 = vadd.xlane.f32.xlu2 %v133_v16 }
  0xa7   :  { %121 = vst [vmem:[#allocation8] sm:$0xf] %v120_v17 }
  0xa8   :  { %195 = dma.vmem_to_hbm [thread:$0]  %s191_s2, 64, %s193_s27, [#allocation7]  }
  0xac   :  { %v118_v18 = vpop.f32.mrf.mxu0 }
 0x118   :  { %v141_v22 = vpop.xlane.xlu0 %140 }
 0x119   :  { %v142_v23 = vmax.f32 %v139_v20, %v141_v22  ;;  %v135_v24 = vpop.xlane.xlu2 %134 }
 0x11a   :  { %v136_v25 = vadd.f32 %v135_v24, %v132_v21 }
 0x11b   :  { %v153_v26 = vsub.f32 %v139_v20, %v142_v23  ;;  %160 = vst.msk [vmem:[#allocation2] sm:$0xff] %vm38_vm0, %v142_v23  ;;  %145 = vperm.xlu0 %268, %v142_v23  }
 0x11c   :  { %138 = vst.msk [vmem:[#allocation4] sm:$0xff] %vm38_vm0, %v136_v25 }
 0x11d   :  { %v154_v31 = vmul.f32 1.442695, %v153_v26 }
 0x122   :  { %v164_v40 = vld [vmem:[#allocation2] sm:$0xff] }
 0x123   :  { %v169_v42 = vld [vmem:[#allocation4] sm:$0xff] }
 0x18d   :  { %v146_v27 = vpop.permute.xlu0 %145 }
 0x18e   :  { %v148_v28 = vsub.f32 %v116_v15, %v146_v27 }
 0x190   :  { %v149_v29 = vmul.f32 1.442695, %v148_v28 }
 0x192   :  { %270 = vpow2.f32 %v149_v29 }
 0x193   :  { %272 = vpow2.f32 %v154_v31 }
 0x198   :  { %v271_v30 = vpop.eup %270 }
 0x199   :  { %151 = vadd.xlane.f32.xlu1 %v271_v30  ;;  %v273_v32 = vpop.eup %272 }
 0x19a   :  { %v157_v34 = vmul.f32 %v273_v32, %v156_v33 }
 0x20c   :  { %v152_v35 = vpop.xlane.xlu1 %151 }
 0x20d   :  { %v158_v36 = vadd.f32 %v157_v34, %v152_v35 }
 0x20f   :  { %159 = vst.msk [vmem:[#allocation3] sm:$0xff] %vm38_vm0, %v158_v36 }
 0x216   :  { %v165_v37 = vld [vmem:[#allocation3] sm:$0xff] }
 0x217   :  { %274 = vlog2.f32 %v165_v37 }
 0x21d   :  { %v275_v38 = vpop.eup %274 }
 0x21e   :  { %v167_v39 = vmul.f32 0.6931472, %v275_v38 }
 0x220   :  { %v168_v41 = vadd.f32 %v167_v39, %v164_v40 }
 0x222   :  { %v170_v43 = vsub.f32 %v168_v41, %v169_v42 }
 0x224   :  { %v172_v44 = vsel %vm171_vm2, %v170_v43, 0.0 }
 0x225   :  { %v173_v45 = vsel %vm38_vm0, %v172_v44, 0.0 }
 0x226   :  { %174 = vadd.xlane.f32.xlu2 %v173_v45 }
 0x299   :  { %v175_v46 = vpop.xlane.xlu2 %174 }
 0x29a   :  { %v176_v47 = vrot.slane %v175_v46, 4 }
 0x29c   :  { %v177_v48 = vadd.f32 %v176_v47, %v175_v46 }
 0x29e   :  { %v178_v49 = vrot.slane %v177_v48, 2 }
 0x2a0   :  { %v179_v50 = vadd.f32 %v178_v49, %v177_v48 }
 0x2a2   :  { %v180_v51 = vrot.slane %v179_v50, 1 }
 0x2a4   :  { %v181_v52 = vadd.f32 %v180_v51, %v179_v50 }
 0x2a6   :  { %258 = vpush %v181_v52 }
 0x2d7   :  { %s259_s7 = spop %258 }
 0x2d8   :  { %v183_v53 = vstv %s259_s7 }
 0x2d9   :  { %184 = vst [vmem:[#allocation9] sm:$0xff] %v183_v53 }
 0x2da   :  { %206 = dma.vmem_to_hbm [thread:$0]  %s202_s29, 128, %s204_s6, [#allocation10]  }
 0x2db   :  { %350 = dma.done.wait [#allocation7], 64  }
 0x2dc   :  { %351 = vsyncadd [#allocation7], 4294967232 }
 0x2dd   :  { %352 = dma.done.wait [#allocation10], 128  }
 0x2de   :  { %353 = vsyncadd [#allocation10], 4294967168 }
 0x2df   :  { %215 = vsyncpa [#allocation6], 1 }
 0x2e0   :  { %216 = vsyncpa [#allocation7], 1 }
 0x2e1   :  { %217 = vsyncpa [#allocation10], 1 }

</bundles_post_ra>
